<compile_context>
chip_gen: v7x
topology: tpu7x:2x2x1
jax: 0.10.0
libtpu: 0.0.40
codegen_flags: <defaults>
</compile_context>

<pallas_src>
import functools

import jax
import jax.numpy as jnp
from jax import lax
from jax.experimental import pallas as pl
from jax.experimental.pallas import tpu as pltpu


def _branch3_kernel(x_ref, w1_ref, s1_ref, b1_ref, wdw_ref, b2_ref, mask_ref,
                    o_ref, buf_ref, *, k, pad, stride, n_rows, n_rows_out):
    # x_ref   : (N*L, C_in)          flattened NLC activations
    # w1_ref  : (C_in, C_out)        1x1 conv weight (transposed)
    # s1_ref  : (1, C_out)           BN1 folded scale
    # b1_ref  : (1, C_out)           BN1 folded bias
    # wdw_ref : (k, C_out)           depthwise taps, BN2 scale folded in
    # b2_ref  : (1, C_out)           BN2 folded bias
    # mask_ref: (N*L, k)             1.0 where the tap stays inside its sample
    # o_ref   : (N*L_out, C_out)
    # buf_ref : (N*L + 2*pad, C_out) f32 VMEM scratch

    # -- Stage 1: 1x1 conv as one big MXU matmul, then BN1 (eval) + ReLU ------
    y1 = jnp.dot(x_ref[...], w1_ref[...], preferred_element_type=jnp.float32)
    y1 = jnp.maximum(y1 * s1_ref[...] + b1_ref[...], 0.0)        # (N*L, C_out)

    # -- Stage 2: depthwise k-tap conv as shift-and-MAC on the VPU ------------
    buf_ref[...] = jnp.zeros_like(buf_ref)
    buf_ref[pl.ds(pad, n_rows), :] = y1                          # zero-padded y1
    acc = jnp.zeros_like(y1)
    for t in range(k):                                           # static unroll
        shifted = buf_ref[pl.ds(t, n_rows), :]                   # row m + (t - pad)
        acc = acc + (shifted * mask_ref[:, t:t + 1]) * wdw_ref[t:t + 1, :]
    out_full = jnp.maximum(acc + b2_ref[...], 0.0)               # BN2 + ReLU

    # -- Stage 3: conv stride along the flattened length axis -----------------
    if stride == 1:
        o_ref[...] = out_full.astype(o_ref.dtype)
    else:
        buf_ref[pl.ds(0, n_rows), :] = out_full                  # reuse scratch
        o_ref[...] = buf_ref[pl.ds(0, n_rows_out, stride), :].astype(o_ref.dtype)


@functools.partial(jax.jit, static_argnames=("stride",))
def branch3_forward(x_ncl, w1, gamma1, beta1, mean1, var1,
                    wdw, gamma2, beta2, mean2, var2, *, stride, eps=1e-5):
    """Fused Branch_3 forward.  x_ncl: (N, C_in, L) -> (N, C_out, L_out)."""
    N, C_in, L = x_ncl.shape
    C_out, _, K = wdw.shape
    pad = (K - 1) // 2
    if L % stride != 0:
        raise ValueError("kernel requires L to be a multiple of the conv stride")
    L_out = (L + 2 * pad - K) // stride + 1
    NL, NLo = N * L, N * L_out

    # Fold BatchNorm (eval mode) into per-channel scale / bias.
    s1 = gamma1 * lax.rsqrt(var1 + eps)
    b1 = beta1 - mean1 * s1
    s2 = gamma2 * lax.rsqrt(var2 + eps)
    b2 = beta2 - mean2 * s2

    # NCL -> NLC -> (N*L, C_in): channels on lanes, one matmul slab for all rows.
    x2d = jnp.transpose(x_ncl, (0, 2, 1)).reshape(NL, C_in)
    w1_t = jnp.transpose(w1[:, :, 0], (1, 0))                    # (C_in, C_out)
    wdw_f = jnp.transpose(wdw[:, 0, :], (1, 0)) * s2[None, :]    # (K, C_out)

    # Per-(row, tap) validity mask, built vectorized (no scatter loops):
    # zero where the depthwise tap would cross a batch boundary.
    l_idx = (jnp.arange(NL, dtype=jnp.int32) % L)[:, None]       # (N*L, 1)
    offs = jnp.arange(K, dtype=jnp.int32)[None, :] - pad         # (1, K)
    mask = ((l_idx + offs >= 0) & (l_idx + offs < L)).astype(x_ncl.dtype)

    kernel = functools.partial(_branch3_kernel, k=K, pad=pad, stride=stride,
                               n_rows=NL, n_rows_out=NLo)
    out2d = pl.pallas_call(
        kernel,
        out_shape=jax.ShapeDtypeStruct((NLo, C_out), x_ncl.dtype),
        # Whole problem fits one grid step at these sizes; for large N*L the
        # grid would tile row blocks (with `pad` halo rows per block).
        grid=(1,),
        in_specs=[
            pl.BlockSpec((NL, C_in), lambda i: (0, 0)),
            pl.BlockSpec((C_in, C_out), lambda i: (0, 0)),
            pl.BlockSpec((1, C_out), lambda i: (0, 0)),
            pl.BlockSpec((1, C_out), lambda i: (0, 0)),
            pl.BlockSpec((K, C_out), lambda i: (0, 0)),
            pl.BlockSpec((1, C_out), lambda i: (0, 0)),
            pl.BlockSpec((NL, K), lambda i: (0, 0)),
        ],
        out_specs=pl.BlockSpec((NLo, C_out), lambda i: (0, 0)),
        scratch_shapes=[pltpu.VMEM((NL + 2 * pad, C_out), jnp.float32)],
        compiler_params=pltpu.CompilerParams(
            dimension_semantics=("arbitrary",)),
    )(x2d, w1_t, s1.reshape(1, C_out), b1.reshape(1, C_out),
      wdw_f, b2.reshape(1, C_out), mask)

    # (N*L_out, C_out) -> (N, C_out, L_out)  (PyTorch NCL layout)
    return jnp.transpose(out2d.reshape(N, L_out, C_out), (0, 2, 1))


def _reference(x_ncl, w1, gamma1, beta1, mean1, var1,
               wdw, gamma2, beta2, mean2, var2, stride, eps=1e-5):
    """Pure-JAX eval-mode reference of Branch_3's forward (NCL layout)."""
    N, C_in, L = x_ncl.shape
    C_out, _, K = wdw.shape
    pad = (K - 1) // 2
    s1 = gamma1 * lax.rsqrt(var1 + eps)
    b1 = beta1 - mean1 * s1
    s2 = gamma2 * lax.rsqrt(var2 + eps)
    b2 = beta2 - mean2 * s2

    y = jnp.einsum("ncl,oc->nol", x_ncl, w1[:, :, 0])            # conv1d k=1
    y = jnp.maximum(y * s1[None, :, None] + b1[None, :, None], 0.0)

    yp = jnp.pad(y, ((0, 0), (0, 0), (pad, pad)))
    L_out = (L + 2 * pad - K) // stride + 1
    cols = []
    for i in range(L_out):                                       # depthwise k=7
        win = yp[:, :, stride * i: stride * i + K]               # (N, C_out, K)
        cols.append(jnp.sum(win * wdw[:, 0, :][None], axis=-1))
    y2 = jnp.stack(cols, axis=-1)                                # (N, C_out, L_out)
    y2 = jnp.maximum(y2 * s2[None, :, None] + b2[None, :, None], 0.0)
    return y2


if __name__ == "__main__":
    # Branch_3(in_planes=4, out_planes=8, stride=2) on a (2, 4, 16) input.
    N, C_in, C_out, L, K, stride = 2, 4, 8, 16, 7, 2

    keys = jax.random.split(jax.random.PRNGKey(0), 11)

    # Round the two MXU operands through bf16 so the check below is insensitive
    # to whichever f32-matmul precision path Mosaic / XLA choose.
    x = jax.random.normal(keys[0], (N, C_in, L), jnp.float32)
    x = x.astype(jnp.bfloat16).astype(jnp.float32)
    w1 = 0.3 * jax.random.normal(keys[1], (C_out, C_in, 1), jnp.float32)
    w1 = w1.astype(jnp.bfloat16).astype(jnp.float32)
    wdw = 0.3 * jax.random.normal(keys[2], (C_out, 1, K), jnp.float32)

    gamma1 = 1.0 + 0.1 * jax.random.normal(keys[3], (C_out,), jnp.float32)
    beta1 = 0.1 * jax.random.normal(keys[4], (C_out,), jnp.float32)
    mean1 = 0.1 * jax.random.normal(keys[5], (C_out,), jnp.float32)
    var1 = jnp.abs(jax.random.normal(keys[6], (C_out,), jnp.float32)) + 0.5
    gamma2 = 1.0 + 0.1 * jax.random.normal(keys[7], (C_out,), jnp.float32)
    beta2 = 0.1 * jax.random.normal(keys[8], (C_out,), jnp.float32)
    mean2 = 0.1 * jax.random.normal(keys[9], (C_out,), jnp.float32)
    var2 = jnp.abs(jax.random.normal(keys[10], (C_out,), jnp.float32)) + 0.5

    out = branch3_forward(x, w1, gamma1, beta1, mean1, var1,
                          wdw, gamma2, beta2, mean2, var2, stride=stride)
    out = jax.block_until_ready(out)

    ref = _reference(x, w1, gamma1, beta1, mean1, var1,
                     wdw, gamma2, beta2, mean2, var2, stride)

    L_out = (L + 2 * ((K - 1) // 2) - K) // stride + 1
    assert out.shape == (N, C_out, L_out), out.shape
    max_err = float(jnp.max(jnp.abs(out - ref)))
    assert jnp.allclose(out, ref, atol=1e-4, rtol=1e-4), max_err

    print("KERNEL_OK")
</pallas_src>

<mosaic_0001>
module attributes {stable_mosaic.version = 11 : i64} {
  func.func @_branch3_kernel(%arg0: i32, %arg1: memref<32x4xf32, #tpu.memory_space<vmem>>, %arg2: memref<4x8xf32, #tpu.memory_space<vmem>>, %arg3: memref<1x8xf32, #tpu.memory_space<vmem>>, %arg4: memref<1x8xf32, #tpu.memory_space<vmem>>, %arg5: memref<7x8xf32, #tpu.memory_space<vmem>>, %arg6: memref<1x8xf32, #tpu.memory_space<vmem>>, %arg7: memref<32x7xf32, #tpu.memory_space<vmem>>, %arg8: memref<16x8xf32, #tpu.memory_space<vmem>>, %arg9: memref<38x8xf32, #tpu.memory_space<vmem>>) attributes {dimension_semantics = [#tpu.dimension_semantics<arbitrary>], iteration_bounds = array<i64: 1>, scalar_prefetch = 0 : i64, scratch_operands = 1 : i64, tpu.core_type = #tpu.core_type<tc>, window_params = [{pipeline_mode = #tpu.pipeline_mode<synchronous>, transform_indices = @transform_0, window_bounds = array<i64: 32, 4>}, {pipeline_mode = #tpu.pipeline_mode<synchronous>, transform_indices = @transform_1, window_bounds = array<i64: 4, 8>}, {pipeline_mode = #tpu.pipeline_mode<synchronous>, transform_indices = @transform_2, window_bounds = array<i64: 1, 8>}, {pipeline_mode = #tpu.pipeline_mode<synchronous>, transform_indices = @transform_3, window_bounds = array<i64: 1, 8>}, {pipeline_mode = #tpu.pipeline_mode<synchronous>, transform_indices = @transform_4, window_bounds = array<i64: 7, 8>}, {pipeline_mode = #tpu.pipeline_mode<synchronous>, transform_indices = @transform_5, window_bounds = array<i64: 1, 8>}, {pipeline_mode = #tpu.pipeline_mode<synchronous>, transform_indices = @transform_6, window_bounds = array<i64: 32, 7>}, {pipeline_mode = #tpu.pipeline_mode<synchronous>, transform_indices = @transform_7, window_bounds = array<i64: 16, 8>}]} {
    %c0 = arith.constant 0 : index
    %c0_0 = arith.constant 0 : index
    %0 = vector.load %arg1[%c0, %c0_0] : memref<32x4xf32, #tpu.memory_space<vmem>>, vector<32x4xf32>
    %c0_1 = arith.constant 0 : index
    %c0_2 = arith.constant 0 : index
    %1 = vector.load %arg2[%c0_1, %c0_2] : memref<4x8xf32, #tpu.memory_space<vmem>>, vector<4x8xf32>
    %cst = arith.constant dense<0.000000e+00> : vector<32x8xf32>
    %2 = tpu.matmul %0, %1, %cst {dimension_numbers = #tpu.dot_dimension_numbers<[1], [0], [0], [1], [0, 0, 1, 1], [], []>} : vector<32x4xf32>, vector<4x8xf32>, vector<32x8xf32> -> vector<32x8xf32>
    %c0_3 = arith.constant 0 : index
    %c0_4 = arith.constant 0 : index
    %3 = vector.load %arg3[%c0_3, %c0_4] : memref<1x8xf32, #tpu.memory_space<vmem>>, vector<1x8xf32>
    %4 = vector.broadcast %3 : vector<1x8xf32> to vector<32x8xf32>
    %5 = arith.mulf %2, %4 : vector<32x8xf32>
    %c0_5 = arith.constant 0 : index
    %c0_6 = arith.constant 0 : index
    %6 = vector.load %arg4[%c0_5, %c0_6] : memref<1x8xf32, #tpu.memory_space<vmem>>, vector<1x8xf32>
    %7 = vector.broadcast %6 : vector<1x8xf32> to vector<32x8xf32>
    %8 = arith.addf %5, %7 : vector<32x8xf32>
    %cst_7 = arith.constant 0.000000e+00 : f32
    %9 = vector.broadcast %cst_7 : f32 to vector<32x8xf32>
    %10 = arith.maximumf %8, %9 : vector<32x8xf32>
    %cst_8 = arith.constant 0.000000e+00 : f32
    %11 = vector.broadcast %cst_8 : f32 to vector<38x8xf32>
    %c0_9 = arith.constant 0 : index
    %c0_10 = arith.constant 0 : index
    %12 = vector.load %arg9[%c0_9, %c0_10] : memref<38x8xf32, #tpu.memory_space<vmem>>, vector<38x8xf32>
    tpu.vector_store %arg9[%c0_9, %c0_10], %11 {strides = array<i32>} : memref<38x8xf32, #tpu.memory_space<vmem>>, vector<38x8xf32>,
    %c3 = arith.constant 3 : index
    %c0_11 = arith.constant 0 : index
    %13 = vector.load %arg9[%c3, %c0_11] : memref<38x8xf32, #tpu.memory_space<vmem>>, vector<32x8xf32>
    tpu.vector_store %arg9[%c3, %c0_11], %10 {strides = array<i32>} : memref<38x8xf32, #tpu.memory_space<vmem>>, vector<32x8xf32>,
    %cst_12 = arith.constant 0.000000e+00 : f32
    %14 = vector.broadcast %cst_12 : f32 to vector<32x8xf32>
    %c0_13 = arith.constant 0 : index
    %c0_14 = arith.constant 0 : index
    %15 = vector.load %arg9[%c0_13, %c0_14] : memref<38x8xf32, #tpu.memory_space<vmem>>, vector<32x8xf32>
    %c0_15 = arith.constant 0 : index
    %c0_16 = arith.constant 0 : index
    %16 = vector.load %arg7[%c0_15, %c0_16] : memref<32x7xf32, #tpu.memory_space<vmem>>, vector<32x1xf32>
    %17 = vector.broadcast %16 : vector<32x1xf32> to vector<32x8xf32>
    %18 = arith.mulf %15, %17 : vector<32x8xf32>
    %c0_17 = arith.constant 0 : index
    %c0_18 = arith.constant 0 : index
    %19 = vector.load %arg5[%c0_17, %c0_18] : memref<7x8xf32, #tpu.memory_space<vmem>>, vector<1x8xf32>
    %20 = vector.broadcast %19 : vector<1x8xf32> to vector<32x8xf32>
    %21 = arith.mulf %18, %20 : vector<32x8xf32>
    %22 = arith.addf %14, %21 : vector<32x8xf32>
    %c1 = arith.constant 1 : index
    %c0_19 = arith.constant 0 : index
    %23 = vector.load %arg9[%c1, %c0_19] : memref<38x8xf32, #tpu.memory_space<vmem>>, vector<32x8xf32>
    %c0_20 = arith.constant 0 : index
    %c1_21 = arith.constant 1 : index
    %24 = vector.load %arg7[%c0_20, %c1_21] : memref<32x7xf32, #tpu.memory_space<vmem>>, vector<32x1xf32>
    %25 = vector.broadcast %24 : vector<32x1xf32> to vector<32x8xf32>
    %26 = arith.mulf %23, %25 : vector<32x8xf32>
    %c1_22 = arith.constant 1 : index
    %c0_23 = arith.constant 0 : index
    %27 = vector.load %arg5[%c1_22, %c0_23] : memref<7x8xf32, #tpu.memory_space<vmem>>, vector<1x8xf32>
    %28 = vector.broadcast %27 : vector<1x8xf32> to vector<32x8xf32>
    %29 = arith.mulf %26, %28 : vector<32x8xf32>
    %30 = arith.addf %22, %29 : vector<32x8xf32>
    %c2 = arith.constant 2 : index
    %c0_24 = arith.constant 0 : index
    %31 = vector.load %arg9[%c2, %c0_24] : memref<38x8xf32, #tpu.memory_space<vmem>>, vector<32x8xf32>
    %c0_25 = arith.constant 0 : index
    %c2_26 = arith.constant 2 : index
    %32 = vector.load %arg7[%c0_25, %c2_26] : memref<32x7xf32, #tpu.memory_space<vmem>>, vector<32x1xf32>
    %33 = vector.broadcast %32 : vector<32x1xf32> to vector<32x8xf32>
    %34 = arith.mulf %31, %33 : vector<32x8xf32>
    %c2_27 = arith.constant 2 : index
    %c0_28 = arith.constant 0 : index
    %35 = vector.load %arg5[%c2_27, %c0_28] : memref<7x8xf32, #tpu.memory_space<vmem>>, vector<1x8xf32>
    %36 = vector.broadcast %35 : vector<1x8xf32> to vector<32x8xf32>
    %37 = arith.mulf %34, %36 : vector<32x8xf32>
    %38 = arith.addf %30, %37 : vector<32x8xf32>
    %c3_29 = arith.constant 3 : index
    %c0_30 = arith.constant 0 : index
    %39 = vector.load %arg9[%c3_29, %c0_30] : memref<38x8xf32, #tpu.memory_space<vmem>>, vector<32x8xf32>
    %c0_31 = arith.constant 0 : index
    %c3_32 = arith.constant 3 : index
    %40 = vector.load %arg7[%c0_31, %c3_32] : memref<32x7xf32, #tpu.memory_space<vmem>>, vector<32x1xf32>
    %41 = vector.broadcast %40 : vector<32x1xf32> to vector<32x8xf32>
    %42 = arith.mulf %39, %41 : vector<32x8xf32>
    %c3_33 = arith.constant 3 : index
    %c0_34 = arith.constant 0 : index
    %43 = vector.load %arg5[%c3_33, %c0_34] : memref<7x8xf32, #tpu.memory_space<vmem>>, vector<1x8xf32>
    %44 = vector.broadcast %43 : vector<1x8xf32> to vector<32x8xf32>
    %45 = arith.mulf %42, %44 : vector<32x8xf32>
    %46 = arith.addf %38, %45 : vector<32x8xf32>
    %c4 = arith.constant 4 : index
    %c0_35 = arith.constant 0 : index
    %47 = vector.load %arg9[%c4, %c0_35] : memref<38x8xf32, #tpu.memory_space<vmem>>, vector<32x8xf32>
    %c0_36 = arith.constant 0 : index
    %c4_37 = arith.constant 4 : index
    %48 = vector.load %arg7[%c0_36, %c4_37] : memref<32x7xf32, #tpu.memory_space<vmem>>, vector<32x1xf32>
    %49 = vector.broadcast %48 : vector<32x1xf32> to vector<32x8xf32>
    %50 = arith.mulf %47, %49 : vector<32x8xf32>
    %c4_38 = arith.constant 4 : index
    %c0_39 = arith.constant 0 : index
    %51 = vector.load %arg5[%c4_38, %c0_39] : memref<7x8xf32, #tpu.memory_space<vmem>>, vector<1x8xf32>
    %52 = vector.broadcast %51 : vector<1x8xf32> to vector<32x8xf32>
    %53 = arith.mulf %50, %52 : vector<32x8xf32>
    %54 = arith.addf %46, %53 : vector<32x8xf32>
    %c5 = arith.constant 5 : index
    %c0_40 = arith.constant 0 : index
    %55 = vector.load %arg9[%c5, %c0_40] : memref<38x8xf32, #tpu.memory_space<vmem>>, vector<32x8xf32>
    %c0_41 = arith.constant 0 : index
    %c5_42 = arith.constant 5 : index
    %56 = vector.load %arg7[%c0_41, %c5_42] : memref<32x7xf32, #tpu.memory_space<vmem>>, vector<32x1xf32>
    %57 = vector.broadcast %56 : vector<32x1xf32> to vector<32x8xf32>
    %58 = arith.mulf %55, %57 : vector<32x8xf32>
    %c5_43 = arith.constant 5 : index
    %c0_44 = arith.constant 0 : index
    %59 = vector.load %arg5[%c5_43, %c0_44] : memref<7x8xf32, #tpu.memory_space<vmem>>, vector<1x8xf32>
    %60 = vector.broadcast %59 : vector<1x8xf32> to vector<32x8xf32>
    %61 = arith.mulf %58, %60 : vector<32x8xf32>
    %62 = arith.addf %54, %61 : vector<32x8xf32>
    %c6 = arith.constant 6 : index
    %c0_45 = arith.constant 0 : index
    %63 = vector.load %arg9[%c6, %c0_45] : memref<38x8xf32, #tpu.memory_space<vmem>>, vector<32x8xf32>
    %c0_46 = arith.constant 0 : index
    %c6_47 = arith.constant 6 : index
    %64 = vector.load %arg7[%c0_46, %c6_47] : memref<32x7xf32, #tpu.memory_space<vmem>>, vector<32x1xf32>
    %65 = vector.broadcast %64 : vector<32x1xf32> to vector<32x8xf32>
    %66 = arith.mulf %63, %65 : vector<32x8xf32>
    %c6_48 = arith.constant 6 : index
    %c0_49 = arith.constant 0 : index
    %67 = vector.load %arg5[%c6_48, %c0_49] : memref<7x8xf32, #tpu.memory_space<vmem>>, vector<1x8xf32>
    %68 = vector.broadcast %67 : vector<1x8xf32> to vector<32x8xf32>
    %69 = arith.mulf %66, %68 : vector<32x8xf32>
    %70 = arith.addf %62, %69 : vector<32x8xf32>
    %c0_50 = arith.constant 0 : index
    %c0_51 = arith.constant 0 : index
    %71 = vector.load %arg6[%c0_50, %c0_51] : memref<1x8xf32, #tpu.memory_space<vmem>>, vector<1x8xf32>
    %72 = vector.broadcast %71 : vector<1x8xf32> to vector<32x8xf32>
    %73 = arith.addf %70, %72 : vector<32x8xf32>
    %cst_52 = arith.constant 0.000000e+00 : f32
    %74 = vector.broadcast %cst_52 : f32 to vector<32x8xf32>
    %75 = arith.maximumf %73, %74 : vector<32x8xf32>
    %c0_53 = arith.constant 0 : index
    %c0_54 = arith.constant 0 : index
    %76 = vector.load %arg9[%c0_53, %c0_54] : memref<38x8xf32, #tpu.memory_space<vmem>>, vector<32x8xf32>
    tpu.vector_store %arg9[%c0_53, %c0_54], %75 {strides = array<i32>} : memref<38x8xf32, #tpu.memory_space<vmem>>, vector<32x8xf32>,
    %c0_55 = arith.constant 0 : index
    %c0_56 = arith.constant 0 : index
    %77 = tpu.strided_load %arg9[%c0_55, %c0_56] {strides = array<i32: 2, 1>} : memref<38x8xf32, #tpu.memory_space<vmem>>, vector<16x8xf32>
    %c0_57 = arith.constant 0 : index
    %c0_58 = arith.constant 0 : index
    %78 = vector.load %arg8[%c0_57, %c0_58] : memref<16x8xf32, #tpu.memory_space<vmem>>, vector<16x8xf32>
    tpu.vector_store %arg8[%c0_57, %c0_58], %77 {strides = array<i32>} : memref<16x8xf32, #tpu.memory_space<vmem>>, vector<16x8xf32>,
    return
  }
  func.func @transform_0(%arg0: i32) -> (i32, i32) {
    %c0_i32 = arith.constant 0 : i32
    %c0_i32_0 = arith.constant 0 : i32
    %c0_i32_1 = arith.constant 0 : i32
    return %c0_i32, %c0_i32_0 : i32, i32
  }
  func.func @transform_1(%arg0: i32) -> (i32, i32) {
    %c0_i32 = arith.constant 0 : i32
    %c0_i32_0 = arith.constant 0 : i32
    %c0_i32_1 = arith.constant 0 : i32
    return %c0_i32, %c0_i32_0 : i32, i32
  }
  func.func @transform_2(%arg0: i32) -> (i32, i32) {
    %c0_i32 = arith.constant 0 : i32
    %c0_i32_0 = arith.constant 0 : i32
    %c0_i32_1 = arith.constant 0 : i32
    return %c0_i32, %c0_i32_0 : i32, i32
  }
  func.func @transform_3(%arg0: i32) -> (i32, i32) {
    %c0_i32 = arith.constant 0 : i32
    %c0_i32_0 = arith.constant 0 : i32
    %c0_i32_1 = arith.constant 0 : i32
    return %c0_i32, %c0_i32_0 : i32, i32
  }
  func.func @transform_4(%arg0: i32) -> (i32, i32) {
    %c0_i32 = arith.constant 0 : i32
    %c0_i32_0 = arith.constant 0 : i32
    %c0_i32_1 = arith.constant 0 : i32
    return %c0_i32, %c0_i32_0 : i32, i32
  }
  func.func @transform_5(%arg0: i32) -> (i32, i32) {
    %c0_i32 = arith.constant 0 : i32
    %c0_i32_0 = arith.constant 0 : i32
    %c0_i32_1 = arith.constant 0 : i32
    return %c0_i32, %c0_i32_0 : i32, i32
  }
  func.func @transform_6(%arg0: i32) -> (i32, i32) {
    %c0_i32 = arith.constant 0 : i32
    %c0_i32_0 = arith.constant 0 : i32
    %c0_i32_1 = arith.constant 0 : i32
    return %c0_i32, %c0_i32_0 : i32, i32
  }
  func.func @transform_7(%arg0: i32) -> (i32, i32) {
    %c0_i32 = arith.constant 0 : i32
    %c0_i32_0 = arith.constant 0 : i32
    %c0_i32_1 = arith.constant 0 : i32
    return %c0_i32, %c0_i32_0 : i32, i32
  }
}

</mosaic_0001>

<bundles_post_ra>
// kernel: branch3_forward.1
= control target key start
LH: loop header
LB: loop body
LE: loop exit
PB: predicated region body
PF: predicated region fallthrough
CT: control target
= control target key end

     0   :  { %vm44_vm0 = vcmask 1043456   ;;  %vm31_vm1 = vcmask 31744   ;;  %v517_v3 = vmov 0   ;;  %v518_v10 = vmov 1   ;;  %s726_s1 = inlined_call_operand.vmem [shape: f32[4,8], index: 1, kind: input, shape index: {}]   ;;  %s727_s0 = inlined_call_operand.vmem [shape: f32[32,4], index: 0, kind: input, shape index: {}]   ;;  %s728_s6 = inlined_call_operand.vmem [shape: f32[32,7], index: 6, kind: input, shape index: {}]   ;;  %s729_s2 = inlined_call_operand.vmem [shape: f32[1,8], index: 2, kind: input, shape index: {}]   ;;  %s730_s3 = inlined_call_operand.vmem [shape: f32[1,8], index: 3, kind: input, shape index: {}]   ;;  %s731_s4 = inlined_call_operand.vmem [shape: f32[7,8], index: 4, kind: input, shape index: {}]   ;;  %s732_s5 = inlined_call_operand.vmem [shape: f32[1,8], index: 5, kind: input, shape index: {}]   ;;  %s733_s7 = inlined_call_operand.vmem [shape: f32[16,8], index: 7, kind: output, shape index: {}]  }
   0x1   :  { %v30_v0 = vld [vmem:[%s726_s1] sm:$0xf]  ;;  %v28_v2 = vld [vmem:[%s727_s0 + $0x10] sm:$0xff]  ;;  %504 = vset.pattern.permute.xlu1 %v517_v3  ;;  %503 = vset.pattern.permute.xlu0 %v517_v3  ;;  %v27_v4 = vld [vmem:[%s727_s0 + $0x8] sm:$0xff]  ;;  %v519_v11 = vmov 2   ;;  %v520_v12 = vmov 3  }
   0x2   :  { %v26_v1 = vld [vmem:[%s727_s0] sm:$0xff]  ;;  %485 = vmatprep.subr.msk.mxu0 %vm44_vm0, %v30_v0  ;;  %493 = vmatprep.subr.msk.mxu1 %vm44_vm0, %v30_v0  ;;  %v29_v5 = vld [vmem:[%s727_s0 + $0x18] sm:$0xff]  ;;  %v176_v6 = vld [vmem:[%s728_s6 + $0x10] sm:$0xff]  ;;  %v521_v13 = vmov 4   ;;  %v522_v14 = vmov 5   ;;  %v523_v15 = vmov 6  }
   0x3   :  { %486 = vmatpush3.msk.msra.mxu0 %vm44_vm0, %v30_v0  ;;  %494 = vmatpush3.msk.msra.mxu1 %vm44_vm0, %v30_v0  ;;  %v174_v7 = vld [vmem:[%s728_s6] sm:$0xff]  ;;  %v177_v8 = vld [vmem:[%s728_s6 + $0x18] sm:$0xff]  ;;  %v175_v9 = vld [vmem:[%s728_s6 + $0x8] sm:$0xff]  ;;  %vm159_vm2 = vcmask 64512   ;;  %vm164_vm3 = vcmask 62464   ;;  %v524_v16 = vmov 0.0  }
   0x4   :  { %487 = vmatprep.mubr.msk.f32.mxu0 %vm31_vm1, %v26_v1  ;;  %490 = vmatprep.mubr.msk.f32.mxu1 %vm31_vm1, %v28_v2  ;;  %161 = vst.msk [vmem:[#allocation2 + $0x8] sm:$0xff] %vm159_vm2, %v524_v16  ;;  %162 = vst.msk [vmem:[#allocation2 + $0x10] sm:$0xff] %vm159_vm2, %v524_v16  ;;  %v470_v34 = vld [vmem:[%s729_s2] ss:$0 sm:$0xff]  ;;  %v640_v58 = vld [vmem:[%s731_s4 + $0x1] ss:$0 sm:$0xff] }
   0x5   :  { %488 = vmatmul.mubr.msk.f32.vlgmr.msra.gmra.mrb[0].mxu0 %vm31_vm1, %v27_v4  ;;  %491 = vmatmul.mubr.msk.f32.vlgmr.msra.gmra.mrb[0].mxu1 %vm31_vm1, %v29_v5  ;;  %160 = vst.msk [vmem:[#allocation2] sm:$0xff] %vm159_vm2, %v524_v16  ;;  %163 = vst.msk [vmem:[#allocation2 + $0x18] sm:$0xff] %vm159_vm2, %v524_v16  ;;  %v471_v37 = vld [vmem:[%s730_s3] ss:$0 sm:$0xff]  ;;  %v645_v63 = vld [vmem:[%s731_s4 + $0x2] ss:$0 sm:$0xff] }
   0x6   :  { %190 = vperm.xlu1 %504, %v176_v6   ;;  %180 = vperm.xlu0 %503, %v174_v7   ;;  %165 = vst.msk [vmem:[#allocation2 + $0x20] sm:$0x3f] %vm164_vm3, %v524_v16  ;;  %v635_v57 = vld [vmem:[%s731_s4] ss:$0 sm:$0xff] }
   0xa   :  { %195 = vperm.xlu1 %504, %v177_v8   ;;  %185 = vperm.xlu0 %503, %v175_v9  }
   0xe   :  { %506 = vset.pattern.permute.xlu1 %v518_v10  ;;  %505 = vset.pattern.permute.xlu0 %v518_v10 }
   0xf   :  { %224 = vperm.xlu1 %506, %v175_v9   ;;  %220 = vperm.xlu0 %505, %v174_v7  }
  0x13   :  { %228 = vperm.xlu1 %506, %v176_v6   ;;  %232 = vperm.xlu0 %505, %v177_v8  }
  0x17   :  { %507 = vset.pattern.permute.xlu1 %v519_v11  ;;  %508 = vset.pattern.permute.xlu0 %v519_v11 }
  0x18   :  { %257 = vperm.xlu1 %507, %v174_v7   ;;  %261 = vperm.xlu0 %508, %v175_v9  }
  0x1c   :  { %265 = vperm.xlu1 %507, %v176_v6   ;;  %509 = vset.pattern.permute.xlu0 %v520_v12 }
  0x1d   :  { %294 = vperm.xlu0 %509, %v174_v7  }
  0x20   :  { %269 = vperm.xlu1 %507, %v177_v8  }
  0x21   :  { %306 = vperm.xlu0 %509, %v177_v8  }
  0x24   :  { %510 = vset.pattern.permute.xlu1 %v520_v12 }
  0x25   :  { %298 = vperm.xlu1 %510, %v175_v9   ;;  %512 = vset.pattern.permute.xlu0 %v521_v13 }
  0x26   :  { %335 = vperm.xlu0 %512, %v175_v9  }
  0x29   :  { %302 = vperm.xlu1 %510, %v176_v6  }
  0x2a   :  { %513 = vset.pattern.permute.xlu0 %v522_v14 }
  0x2b   :  { %368 = vperm.xlu0 %513, %v174_v7  }
  0x2d   :  { %511 = vset.pattern.permute.xlu1 %v521_v13 }
  0x2e   :  { %331 = vperm.xlu1 %511, %v174_v7  }
  0x2f   :  { %380 = vperm.xlu0 %513, %v177_v8  }
  0x32   :  { %339 = vperm.xlu1 %511, %v176_v6  }
  0x33   :  { %516 = vset.pattern.permute.xlu0 %v523_v15 }
  0x34   :  { %409 = vperm.xlu0 %516, %v175_v9  }
  0x36   :  { %343 = vperm.xlu1 %511, %v177_v8  }
  0x3a   :  { %514 = vset.pattern.permute.xlu1 %v522_v14  ;;  %v652_v14 = vld [vmem:[%s731_s4 + $0x3] ss:$0 sm:$0xff] }
  0x3b   :  { %372 = vperm.xlu1 %514, %v175_v9  }
  0x3f   :  { %376 = vperm.xlu1 %514, %v176_v6  }
  0x43   :  { %515 = vset.pattern.permute.xlu1 %v523_v15 }
  0x44   :  { %405 = vperm.xlu1 %515, %v174_v7  }
  0x48   :  { %413 = vperm.xlu1 %515, %v176_v6  }
  0x4c   :  { %417 = vperm.xlu1 %515, %v177_v8  }
  0x85   :  { %v191_v17 = vpop.permute.xlu1 %190  ;;  %v602_v23 = vpop.permute.xlu0 %180 }
  0x89   :  { %v596_v18 = vpop.permute.xlu1 %195  ;;  %v186_v25 = vpop.permute.xlu0 %185 }
  0x8e   :  { %v598_v19 = vpop.permute.xlu1 %224  ;;  %v606_v27 = vpop.permute.xlu0 %220 }
  0x92   :  { %v229_v20 = vpop.permute.xlu1 %228  ;;  %v608_v29 = vpop.permute.xlu0 %232 }
  0x97   :  { %v600_v21 = vpop.permute.xlu1 %257  ;;  %v612_v31 = vpop.permute.xlu0 %261 }
  0x9b   :  { %v266_v22 = vpop.permute.xlu1 %265 }
  0x9c   :  { %v614_v33 = vpop.permute.xlu0 %294 }
  0x9f   :  { %v604_v24 = vpop.permute.xlu1 %269 }
  0xa0   :  { %v624_v47 = vpop.permute.xlu0 %306 }
  0xa4   :  { %v299_v26 = vpop.permute.xlu1 %298 }
  0xa5   :  { %v336_v55 = vpop.permute.xlu0 %335 }
  0xa8   :  { %v303_v28 = vpop.permute.xlu1 %302 }
  0xaa   :  { %v369_v6 = vpop.permute.xlu0 %368 }
  0xad   :  { %v610_v30 = vpop.permute.xlu1 %331 }
  0xb1   :  { %v340_v32 = vpop.permute.xlu1 %339 }
  0xb5   :  { %v619_v35 = vpop.permute.xlu1 %343 }
  0xba   :  { %v626_v52 = vpop.permute.xlu1 %372 }
  0xbe   :  { %v377_v56 = vpop.permute.xlu1 %376 }
  0xd8   :  { %v489_v36 = vpop.f32.mrb[0].mxu0  ;;  %v492_v38 = vpop.f32.mrb[0].mxu1 }
  0xd9   :  { %v141_v39 = vmul.f32 %v489_v36, %v470_v34  ;;  %v143_v40 = vmul.f32 %v492_v38, %v470_v34  ;;  %v114_v41 = vpop.f32.mrb[1].mxu0  ;;  %v124_v42 = vpop.f32.mrb[1].mxu1 }
  0xda   :  { %v140_v43 = vmul.f32 %v470_v34, %v114_v41  ;;  %v142_v44 = vmul.f32 %v470_v34, %v124_v42 }
  0xdb   :  { %v152_v45 = vadd.f32 %v471_v37, %v141_v39  ;;  %v154_v46 = vadd.f32 %v471_v37, %v143_v40 }
  0xdc   :  { %v151_v48 = vadd.f32 %v471_v37, %v140_v43  ;;  %v153_v49 = vadd.f32 %v471_v37, %v142_v44 }
  0xdd   :  { %v156_v50 = vmax.f32 %v152_v45, 0.0  ;;  %v158_v51 = vmax.f32 %v154_v46, 0.0 }
  0xde   :  { %v155_v53 = vmax.f32 %v151_v48, 0.0  ;;  %v157_v54 = vmax.f32 %v153_v49, 0.0 }
  0xdf   :  { %167 = vst.msk [vmem:[#allocation2 + $0xb] sm:$0xff] %vm159_vm2, %v156_v50  ;;  %169 = vst.msk [vmem:[#allocation2 + $0x1b] sm:$0xff] %vm159_vm2, %v158_v51  ;;  %v675_v51 = vld [vmem:[%s731_s4 + $0x5] ss:$0 sm:$0xff] }
  0xe0   :  { %166 = vst.msk [vmem:[#allocation2 + $0x3] sm:$0xff] %vm159_vm2, %v155_v53  ;;  %168 = vst.msk [vmem:[#allocation2 + $0x13] sm:$0xff] %vm159_vm2, %v157_v54 }
  0xe6   :  { %v290_v59 = vld [vmem:[#allocation2 + $0xb] sm:$0xff] }
  0xe7   :  { %v172_v60 = vld [vmem:[#allocation2 + $0x10] sm:$0xff]  ;;  %v171_v8 = vld [vmem:[#allocation2 + $0x8] sm:$0xff]  ;;  %v310_v11 = vmul.f32 %v299_v26, %v290_v59  ;;  %v173_v59 = vld [vmem:[#allocation2 + $0x18] sm:$0xff] }
  0xe8   :  { %v217_v61 = vld [vmem:[#allocation2 + $0x11] sm:$0xff]  ;;  %v200_v0 = vmul.f32 %v191_v17, %v172_v60  ;;  %v216_v9 = vld [vmem:[#allocation2 + $0x9] sm:$0xff]  ;;  %v199_v16 = vmul.f32 %v186_v25, %v171_v8  ;;  %v406_v17 = vpop.permute.xlu1 %405  ;;  %v215_v34 = vld [vmem:[#allocation2 + $0x1] sm:$0xff] }
  0xe9   :  { %v254_v62 = vld [vmem:[#allocation2 + $0x12] sm:$0xff]  ;;  %v237_v1 = vmul.f32 %v229_v20, %v217_v61  ;;  %v253_v10 = vld [vmem:[#allocation2 + $0xa] sm:$0xff]  ;;  %v170_v20 = vld [vmem:[#allocation2] sm:$0xff]  ;;  %v236_v26 = vmul.f32 %v598_v19, %v216_v9  ;;  %v319_v40 = vmul.f32 %v652_v14, %v310_v11  ;;  %v235_v43 = vmul.f32 %v606_v27, %v215_v34 }
  0xea   :  { %v274_v2 = vmul.f32 %v266_v22, %v254_v62  ;;  %v291_v3 = vld [vmem:[#allocation2 + $0x13] sm:$0xff]  ;;  %v209_v12 = vmul.f32 %v635_v57, %v200_v0  ;;  %v657_v22 = vld [vmem:[%s731_s4 + $0x4] ss:$0 sm:$0xff]  ;;  %v208_v39 = vmul.f32 %v635_v57, %v199_v16  ;;  %v198_v42 = vmul.f32 %v602_v23, %v170_v20  ;;  %v683_v61 = vld [vmem:[%s731_s4 + $0x6] ss:$0 sm:$0xff] }
  0xeb   :  { %v328_v4 = vld [vmem:[#allocation2 + $0x14] sm:$0xff]  ;;  %v311_v7 = vmul.f32 %v303_v28, %v291_v3  ;;  %v246_v13 = vmul.f32 %v640_v58, %v237_v1  ;;  %v252_v36 = vld [vmem:[#allocation2 + $0x2] sm:$0xff]  ;;  %v245_v25 = vmul.f32 %v640_v58, %v236_v26  ;;  %v327_v41 = vld [vmem:[#allocation2 + $0xc] sm:$0xff]  ;;  %v244_v54 = vmul.f32 %v640_v58, %v235_v43 }
  0xec   :  { %v365_v5 = vld [vmem:[#allocation2 + $0x15] sm:$0xff]  ;;  %v348_v15 = vmul.f32 %v340_v32, %v328_v4  ;;  %v283_v38 = vmul.f32 %v645_v63, %v274_v2  ;;  %v273_v32 = vmul.f32 %v612_v31, %v253_v10  ;;  %v289_v44 = vld [vmem:[#allocation2 + $0x3] sm:$0xff]  ;;  %v272_v48 = vmul.f32 %v600_v21, %v252_v36  ;;  %v670_v31 = vpop.permute.xlu0 %380  ;;  %v414_v1 = vpop.permute.xlu1 %413 }
  0xed   :  { %v385_v28 = vmul.f32 %v377_v56, %v365_v5  ;;  %v250_v37 = vadd.f32 %v246_v13, %v209_v12  ;;  %v320_v45 = vmul.f32 %v652_v14, %v311_v7  ;;  %v326_v49 = vld [vmem:[#allocation2 + $0x4] sm:$0xff]  ;;  %v402_v50 = vld [vmem:[#allocation2 + $0x16] sm:$0xff]  ;;  %v249_v23 = vadd.f32 %v245_v25, %v208_v39  ;;  %v479_v25 = vld [vmem:[%s732_s5] ss:$0 sm:$0xff] }
  0xee   :  { %v357_v46 = vmul.f32 %v657_v22, %v348_v15  ;;  %v282_v27 = vmul.f32 %v645_v63, %v273_v32  ;;  %v207_v53 = vmul.f32 %v635_v57, %v198_v42  ;;  %v363_v56 = vld [vmem:[#allocation2 + $0x5] sm:$0xff]  ;;  %v347_v21 = vmul.f32 %v336_v55, %v327_v41  ;;  %v218_v7 = vld [vmem:[#allocation2 + $0x19] sm:$0xff] }
  0xef   :  { %v287_v19 = vadd.f32 %v283_v38, %v250_v37  ;;  %v281_v62 = vmul.f32 %v645_v63, %v272_v48  ;;  %v309_v0 = vmul.f32 %v614_v33, %v289_v44  ;;  %v346_v4 = vmul.f32 %v610_v30, %v326_v49  ;;  %v255_v8 = vld [vmem:[#allocation2 + $0x1a] sm:$0xff]  ;;  %v400_v10 = vld [vmem:[#allocation2 + $0x6] sm:$0xff]  ;;  %v401_v38 = vld [vmem:[#allocation2 + $0xe] sm:$0xff] }
  0xf0   :  { %v286_v2 = vadd.f32 %v282_v27, %v249_v23  ;;  %v248_v3 = vadd.f32 %v244_v54, %v207_v53  ;;  %v422_v5 = vmul.f32 %v414_v1, %v402_v50  ;;  %v394_v55 = vmul.f32 %v675_v51, %v385_v28  ;;  %v292_v20 = vld [vmem:[#allocation2 + $0x1b] sm:$0xff]  ;;  %v410_v37 = vpop.permute.xlu0 %409  ;;  %v364_v28 = vld [vmem:[#allocation2 + $0xd] sm:$0xff]  ;;  %v418_v27 = vpop.permute.xlu1 %417 }
  0xf1   :  { %v324_v60 = vadd.f32 %v320_v45, %v287_v19  ;;  %v383_v11 = vmul.f32 %v369_v6, %v363_v56  ;;  %v201_v12 = vmul.f32 %v596_v18, %v173_v59  ;;  %v318_v16 = vmul.f32 %v652_v14, %v309_v0  ;;  %v366_v44 = vld [vmem:[#allocation2 + $0x1d] sm:$0xff] }
  0xf2   :  { %v323_v13 = vadd.f32 %v319_v40, %v286_v2  ;;  %v285_v15 = vadd.f32 %v281_v62, %v248_v3  ;;  %v431_v33 = vmul.f32 %v683_v61, %v422_v5  ;;  %v238_v34 = vmul.f32 %v608_v29, %v218_v7  ;;  %v329_v40 = vld [vmem:[#allocation2 + $0x1c] sm:$0xff] }
  0xf3   :  { %v361_v9 = vadd.f32 %v357_v46, %v324_v60  ;;  %v210_v30 = vmul.f32 %v635_v57, %v201_v12  ;;  %v275_v36 = vmul.f32 %v604_v24, %v255_v8  ;;  %v356_v6 = vmul.f32 %v657_v22, %v347_v21  ;;  %v403_v53 = vld [vmem:[#allocation2 + $0x1e] sm:$0xff] }
  0xf4   :  { %v420_v18 = vmul.f32 %v406_v17, %v400_v10  ;;  %v322_v39 = vadd.f32 %v318_v16, %v285_v15  ;;  %v355_v32 = vmul.f32 %v657_v22, %v346_v4  ;;  %v392_v57 = vmul.f32 %v675_v51, %v383_v11 }
  0xf5   :  { %v398_v26 = vadd.f32 %v394_v55, %v361_v9  ;;  %v247_v29 = vmul.f32 %v640_v58, %v238_v34  ;;  %v312_v24 = vmul.f32 %v624_v47, %v292_v20  ;;  %v360_v42 = vadd.f32 %v356_v6, %v323_v13 }
  0xf6   :  { %v359_v43 = vadd.f32 %v355_v32, %v322_v39  ;;  %v384_v17 = vmul.f32 %v626_v52, %v364_v28  ;;  %v421_v19 = vmul.f32 %v410_v37, %v401_v38  ;;  %v284_v48 = vmul.f32 %v645_v63, %v275_v36 }
  0xf7   :  { %v435_v41 = vadd.f32 %v431_v33, %v398_v26  ;;  %v251_v46 = vadd.f32 %v247_v29, %v210_v30  ;;  %v349_v49 = vmul.f32 %v619_v35, %v329_v40  ;;  %v429_v50 = vmul.f32 %v683_v61, %v420_v18 }
  0xf8   :  { %v396_v23 = vadd.f32 %v392_v57, %v359_v43  ;;  %v393_v58 = vmul.f32 %v675_v51, %v384_v17  ;;  %v321_v56 = vmul.f32 %v652_v14, %v312_v24  ;;  %v386_v52 = vmul.f32 %v670_v31, %v366_v44 }
  0xf9   :  { %v446_v45 = vadd.f32 %v479_v25, %v435_v41  ;;  %v288_v54 = vadd.f32 %v284_v48, %v251_v46  ;;  %v430_v21 = vmul.f32 %v683_v61, %v421_v19  ;;  %v358_v35 = vmul.f32 %v657_v22, %v349_v49 }
  0xfa   :  { %v433_v59 = vadd.f32 %v429_v50, %v396_v23  ;;  %v397_v60 = vadd.f32 %v393_v58, %v360_v42  ;;  %v423_v62 = vmul.f32 %v418_v27, %v403_v53  ;;  %v395_v3 = vmul.f32 %v675_v51, %v386_v52 }
  0xfb   :  { %v450_v47 = vmax.f32 %v446_v45, 0.0  ;;  %v325_v63 = vadd.f32 %v321_v56, %v288_v54 }
  0xfc   :  { %v444_v0 = vadd.f32 %v479_v25, %v433_v59  ;;  %v434_v1 = vadd.f32 %v430_v21, %v397_v60  ;;  %v432_v31 = vmul.f32 %v683_v61, %v423_v62 }
  0xfd   :  { %454 = vst.msk [vmem:[#allocation2 + $0x10] sm:$0xff] %vm159_vm2, %v450_v47  ;;  %v362_v2 = vadd.f32 %v358_v35, %v325_v63 }
  0xfe   :  { %v448_v4 = vmax.f32 %v444_v0, 0.0  ;;  %v445_v5 = vadd.f32 %v479_v25, %v434_v1 }
  0xff   :  { %v399_v14 = vadd.f32 %v395_v3, %v362_v2 }
 0x100   :  { %452 = vst.msk [vmem:[#allocation2] sm:$0xff] %vm159_vm2, %v448_v4  ;;  %v449_v7 = vmax.f32 %v445_v5, 0.0 }
 0x101   :  { %v436_v8 = vadd.f32 %v432_v31, %v399_v14 }
 0x102   :  { %453 = vst.msk [vmem:[#allocation2 + $0x8] sm:$0xff] %vm159_vm2, %v449_v7 }
 0x103   :  { %v447_v22 = vadd.f32 %v479_v25, %v436_v8 }
 0x105   :  { %v451_v9 = vmax.f32 %v447_v22, 0.0 }
 0x107   :  { %455 = vst.msk [vmem:[#allocation2 + $0x18] sm:$0xff] %vm159_vm2, %v451_v9 }
 0x109   :  { %v456_v55 = vld [vmem:[#allocation2] ss:$2 sm:$0xff] }
 0x10a   :  { %459 = vst.msk [vmem:[%s733_s7] sm:$0xff] %vm159_vm2, %v456_v55 }
 0x10e   :  { %v458_v51 = vld [vmem:[#allocation2 + $0x10] ss:$2 sm:$0xff] }
 0x10f   :  { %460 = vst.msk [vmem:[%s733_s7 + $0x8] sm:$0xff] %vm159_vm2, %v458_v51 }

</bundles_post_ra>
